<compile_context>
chip_gen: v7x
topology: tpu7x:2x2x1
jax: 0.10.0
libtpu: 0.0.40
codegen_flags: <defaults>
</compile_context>

<pallas_src>
import jax
import jax.numpy as jnp
from jax.experimental import pallas as pl
from jax.experimental.pallas import tpu as pltpu


# ----------------------------------------------------------------------------
# Pallas kernel: fused embed+project, serial tanh recurrence, mask-once store.
# ----------------------------------------------------------------------------
def _rnn_impatient_kernel(len_ref, msg_ref, proj_ref, whh_ref, out_ref):
    """
    len_ref  : [TB, 1]    i32  per-sequence lengths (0 for batch-pad rows)
    msg_ref  : [T, TB]    i32  token ids, time-major (batch-pad rows are 0)
    proj_ref : [V, H]     f32  embedding @ W_ih^T + (b_ih + b_hh)  (fused lookup+proj)
    whh_ref  : [H, H]     f32  W_hh, untransposed (contracted on dim 1 below)
    out_ref  : [T, TB, H] f32  hidden state at every reading position (zero-masked)
    """
    T, TB, H = out_ref.shape
    V = proj_ref.shape[0]

    # ---- Fused embedding lookup + input projection, hoisted off the serial chain.
    # one_hot(ids) @ proj == Embedding(ids) @ W_ih^T + b_ih + b_hh for ALL steps in
    # one MXU matmul (vocab is tiny, so the one-hot is cheap and lane-friendly).
    ids = msg_ref[...]                                                      # [T, TB]
    iota_v = jax.lax.broadcasted_iota(jnp.int32, (T, TB, V), 2)
    one_hot = (ids[:, :, None] == iota_v).astype(jnp.float32)              # [T, TB, V]
    g = jnp.dot(one_hot.reshape(T * TB, V), proj_ref[...],
                preferred_element_type=jnp.float32)                        # [T*TB, H]

    whh = whh_ref[...]                                                      # [H, H]
    dims = (((1,), (1,)), ((), ()))        # contract h dim 1 with whh dim 1 == h @ W_hh^T

    # ---- Serial tanh recurrence, h0 = 0 (PyTorch default).  T is small and static,
    # so the fully-unrolled loop gives the LLO scheduler full visibility.
    # TODO(synk): switch to lax.fori_loop + a VMEM scratch for g if T*TB*H grows.
    h = jnp.zeros((TB, H), jnp.float32)
    hs = []
    for t in range(T):
        h = jnp.tanh(
            g[t * TB:(t + 1) * TB, :]       # sublane-aligned slice (TB is a multiple of 8)
            + jax.lax.dot_general(h, whh, dims, preferred_element_type=jnp.float32)
        )
        hs.append(h)

    # ---- pad_packed_sequence zero-pads positions t >= lengths[b]: mask once over the
    # whole block and store it as a single slab.
    seq = jnp.stack(hs, axis=0)                                             # [T, TB, H]
    t_idx = jax.lax.broadcasted_iota(jnp.int32, (T, TB, 1), 0)
    valid = t_idx < len_ref[...][None, :, :]                                # [T, TB, 1]
    out_ref[...] = jnp.where(valid, seq, 0.0).astype(out_ref.dtype)


def _rnn_sequence(msg_tm, lengths_col, proj_table, w_hh, *, batch_tile):
    """msg_tm: [T, B_pad] i32, lengths_col: [B_pad, 1] i32 -> [T, B_pad, H] f32."""
    T, B_pad = msg_tm.shape
    V, H = proj_table.shape
    grid = (B_pad // batch_tile,)

    grid_spec = pltpu.PrefetchScalarGridSpec(
        num_scalar_prefetch=0,
        grid=grid,                       # batch tiles; recurrence stays inside the kernel
        in_specs=[
            pl.BlockSpec((batch_tile, 1), lambda i: (i, 0)),   # lengths
            pl.BlockSpec((T, batch_tile), lambda i: (0, i)),   # token ids (time-major)
            pl.BlockSpec((V, H), lambda i: (0, 0)),            # fused embed+proj table
            pl.BlockSpec((H, H), lambda i: (0, 0)),            # W_hh
        ],
        out_specs=pl.BlockSpec((T, batch_tile, H), lambda i: (0, i, 0)),
    )

    return pl.pallas_call(
        _rnn_impatient_kernel,
        out_shape=jax.ShapeDtypeStruct((T, B_pad, H), jnp.float32),
        grid_spec=grid_spec,
        compiler_params=pltpu.CompilerParams(
            # Batch tiles are independent -> megacore / v7x dual-TC sharding.
            dimension_semantics=("parallel",),
        ),
    )(lengths_col, msg_tm, proj_table, w_hh)


# ----------------------------------------------------------------------------
# Glue: parameters, find_lengths, wrapper (fully jit-able, no host sync).
# ----------------------------------------------------------------------------
def init_params(key, vocab_size, embed_dim, n_hidden):
    k_emb, k_wih, k_whh, k_bih, k_bhh = jax.random.split(key, 5)
    bound = 1.0 / jnp.sqrt(n_hidden)
    return {
        # nn.Embedding default init: N(0, 1)
        "embedding": jax.random.normal(k_emb, (vocab_size, embed_dim), jnp.float32),
        # nn.RNN default init: U(-1/sqrt(H), 1/sqrt(H))
        "w_ih": jax.random.uniform(k_wih, (n_hidden, embed_dim), jnp.float32, -bound, bound),
        "w_hh": jax.random.uniform(k_whh, (n_hidden, n_hidden), jnp.float32, -bound, bound),
        "b_ih": jax.random.uniform(k_bih, (n_hidden,), jnp.float32, -bound, bound),
        "b_hh": jax.random.uniform(k_bhh, (n_hidden,), jnp.float32, -bound, bound),
    }


def find_lengths(message):
    """EGG find_lengths: index of first eos(=0) + 1, capped at T."""
    T = message.shape[1]
    zero_seen = jnp.cumsum((message == 0).astype(jnp.int32), axis=1) > 0
    lengths = T - jnp.sum(zero_seen.astype(jnp.int32), axis=1)
    return jnp.minimum(lengths + 1, T).astype(jnp.int32)


def rnn_encoder_impatient_forward(params, message, lengths=None):
    """message: [B, T] int32.  Returns (seq_hidden [T, B, H], lengths [B])."""
    B, T = message.shape
    if lengths is None:
        lengths = find_lengths(message)
    lengths = lengths.astype(jnp.int32)

    H = params["w_hh"].shape[0]
    V = params["embedding"].shape[0]

    # Fused embedding + input projection table: proj[v] = E[v] @ W_ih^T + b_ih + b_hh.
    # (One tiny [V,E]x[E,H] matmul; no explicit weight transposes.)
    proj_table = (
        jax.lax.dot_general(params["embedding"], params["w_ih"],
                            (((1,), (1,)), ((), ())),
                            preferred_element_type=jnp.float32)
        + (params["b_ih"] + params["b_hh"])[None, :]
    )                                                                        # [V, H]

    # Pad the batch to a sublane tile (>=8) / batch-tile multiple; pad rows carry
    # token 0 and length 0, so they are fully masked to zero inside the kernel.
    if B <= 128:
        batch_tile = max(8, ((B + 7) // 8) * 8)
        B_pad = batch_tile
    else:
        batch_tile = 128
        B_pad = ((B + 127) // 128) * 128
    pad_b = B_pad - B

    msg_tm = jnp.transpose(
        jnp.pad(message.astype(jnp.int32), ((0, pad_b), (0, 0)))
    )                                                                        # [T, B_pad]
    len_col = jnp.pad(lengths, (0, pad_b)).reshape(B_pad, 1)                 # [B_pad, 1]

    seq = _rnn_sequence(msg_tm, len_col, proj_table, params["w_hh"],
                        batch_tile=batch_tile)                               # [T, B_pad, H]
    seq_hidden = seq[:, :B, :] if pad_b else seq

    # TODO(synk): PyTorch's pad_packed_sequence trims the time axis to max(lengths);
    # here it stays at the static T (positions t >= lengths[b] are exactly zero) so
    # the wrapper stays jit-able with no device->host sync / per-length recompile.
    return seq_hidden, lengths


if __name__ == "__main__":
    # Small shapes implied by the module: B=2, T=8, vocab=10, E=32, H=32.
    vocab_size, embed_dim, n_hidden = 10, 32, 32
    B, T = 2, 8

    key = jax.random.PRNGKey(0)
    k_params, k_msg = jax.random.split(key)
    params = init_params(k_params, vocab_size, embed_dim, n_hidden)

    # Deterministic messages; force an eos (0) somewhere so lengths differ.
    message = jax.random.randint(k_msg, (B, T), 1, vocab_size, dtype=jnp.int32)
    message = message.at[0, 5].set(0)   # batch 0 has eos at position 5 -> length 6

    fwd = jax.jit(rnn_encoder_impatient_forward)
    seq_hidden, lengths = fwd(params, message)
    jax.block_until_ready(seq_hidden)
    jax.block_until_ready(lengths)

    assert seq_hidden.shape == (T, B, n_hidden)
    # Positions t >= length must be exactly zero (pad_packed_sequence semantics).
    l0 = int(lengths[0])
    assert bool(jnp.all(seq_hidden[l0:, 0, :] == 0.0))
    assert bool(jnp.any(seq_hidden[l0 - 1, 0, :] != 0.0))
    print("KERNEL_OK")
</pallas_src>

<mosaic_0001>
module attributes {stable_mosaic.version = 11 : i64} {
  func.func @_rnn_impatient_kernel(%arg0: i32, %arg1: memref<8x1xi32, #tpu.memory_space<vmem>>, %arg2: memref<8x8xi32, #tpu.memory_space<vmem>>, %arg3: memref<10x32xf32, #tpu.memory_space<vmem>>, %arg4: memref<32x32xf32, #tpu.memory_space<vmem>>, %arg5: memref<8x8x32xf32, #tpu.memory_space<vmem>>) attributes {dimension_semantics = [#tpu.dimension_semantics<parallel>], iteration_bounds = array<i64: 1>, scalar_prefetch = 0 : i64, scratch_operands = 0 : i64, tpu.core_type = #tpu.core_type<tc>, window_params = [{transform_indices = @transform_0, window_bounds = array<i64: 8, 1>}, {transform_indices = @transform_1, window_bounds = array<i64: 8, 8>}, {pipeline_mode = #tpu.pipeline_mode<synchronous>, transform_indices = @transform_2, window_bounds = array<i64: 10, 32>}, {pipeline_mode = #tpu.pipeline_mode<synchronous>, transform_indices = @transform_3, window_bounds = array<i64: 32, 32>}, {transform_indices = @transform_4, window_bounds = array<i64: 8, 8, 32>}]} {
    %c0 = arith.constant 0 : index
    %c0_0 = arith.constant 0 : index
    %0 = vector.load %arg2[%c0, %c0_0] : memref<8x8xi32, #tpu.memory_space<vmem>>, vector<8x8xi32>
    %1 = tpu.iota {dimensions = array<i32: 2>} : vector<8x8x10xi32>
    %2 = vector.shape_cast %0 : vector<8x8xi32> to vector<8x8x1xi32>
    %3 = vector.broadcast %2 : vector<8x8x1xi32> to vector<8x8x10xi32>
    %4 = arith.cmpi eq, %3, %1 : vector<8x8x10xi32>
    %5 = arith.extui %4 : vector<8x8x10xi1> to vector<8x8x10xi32>
    %6 = arith.sitofp %5 : vector<8x8x10xi32> to vector<8x8x10xf32>
    %7 = vector.shape_cast %6 : vector<8x8x10xf32> to vector<64x10xf32>
    %c0_1 = arith.constant 0 : index
    %c0_2 = arith.constant 0 : index
    %8 = vector.load %arg3[%c0_1, %c0_2] : memref<10x32xf32, #tpu.memory_space<vmem>>, vector<10x32xf32>
    %cst = arith.constant dense<0.000000e+00> : vector<64x32xf32>
    %9 = tpu.matmul %7, %8, %cst {dimension_numbers = #tpu.dot_dimension_numbers<[1], [0], [0], [1], [0, 0, 1, 1], [], []>} : vector<64x10xf32>, vector<10x32xf32>, vector<64x32xf32> -> vector<64x32xf32>
    %c0_3 = arith.constant 0 : index
    %c0_4 = arith.constant 0 : index
    %10 = vector.load %arg4[%c0_3, %c0_4] : memref<32x32xf32, #tpu.memory_space<vmem>>, vector<32x32xf32>
    %cst_5 = arith.constant 0.000000e+00 : f32
    %11 = vector.broadcast %cst_5 : f32 to vector<8x32xf32>
    %12 = vector.extract_strided_slice %9 {offsets = [0, 0], sizes = [8, 32], strides = [1, 1]} : vector<64x32xf32> to vector<8x32xf32>
    %cst_6 = arith.constant dense<0.000000e+00> : vector<8x32xf32>
    %13 = tpu.matmul %11, %10, %cst_6 {dimension_numbers = #tpu.dot_dimension_numbers<[1], [1], [0], [0], [0, 0, 1, 0], [], []>} : vector<8x32xf32>, vector<32x32xf32>, vector<8x32xf32> -> vector<8x32xf32>
    %14 = arith.addf %12, %13 : vector<8x32xf32>
    %15 = math.tanh %14 : vector<8x32xf32>
    %16 = vector.extract_strided_slice %9 {offsets = [8, 0], sizes = [8, 32], strides = [1, 1]} : vector<64x32xf32> to vector<8x32xf32>
    %cst_7 = arith.constant dense<0.000000e+00> : vector<8x32xf32>
    %17 = tpu.matmul %15, %10, %cst_7 {dimension_numbers = #tpu.dot_dimension_numbers<[1], [1], [0], [0], [0, 0, 1, 0], [], []>} : vector<8x32xf32>, vector<32x32xf32>, vector<8x32xf32> -> vector<8x32xf32>
    %18 = arith.addf %16, %17 : vector<8x32xf32>
    %19 = math.tanh %18 : vector<8x32xf32>
    %20 = vector.extract_strided_slice %9 {offsets = [16, 0], sizes = [8, 32], strides = [1, 1]} : vector<64x32xf32> to vector<8x32xf32>
    %cst_8 = arith.constant dense<0.000000e+00> : vector<8x32xf32>
    %21 = tpu.matmul %19, %10, %cst_8 {dimension_numbers = #tpu.dot_dimension_numbers<[1], [1], [0], [0], [0, 0, 1, 0], [], []>} : vector<8x32xf32>, vector<32x32xf32>, vector<8x32xf32> -> vector<8x32xf32>
    %22 = arith.addf %20, %21 : vector<8x32xf32>
    %23 = math.tanh %22 : vector<8x32xf32>
    %24 = vector.extract_strided_slice %9 {offsets = [24, 0], sizes = [8, 32], strides = [1, 1]} : vector<64x32xf32> to vector<8x32xf32>
    %cst_9 = arith.constant dense<0.000000e+00> : vector<8x32xf32>
    %25 = tpu.matmul %23, %10, %cst_9 {dimension_numbers = #tpu.dot_dimension_numbers<[1], [1], [0], [0], [0, 0, 1, 0], [], []>} : vector<8x32xf32>, vector<32x32xf32>, vector<8x32xf32> -> vector<8x32xf32>
    %26 = arith.addf %24, %25 : vector<8x32xf32>
    %27 = math.tanh %26 : vector<8x32xf32>
    %28 = vector.extract_strided_slice %9 {offsets = [32, 0], sizes = [8, 32], strides = [1, 1]} : vector<64x32xf32> to vector<8x32xf32>
    %cst_10 = arith.constant dense<0.000000e+00> : vector<8x32xf32>
    %29 = tpu.matmul %27, %10, %cst_10 {dimension_numbers = #tpu.dot_dimension_numbers<[1], [1], [0], [0], [0, 0, 1, 0], [], []>} : vector<8x32xf32>, vector<32x32xf32>, vector<8x32xf32> -> vector<8x32xf32>
    %30 = arith.addf %28, %29 : vector<8x32xf32>
    %31 = math.tanh %30 : vector<8x32xf32>
    %32 = vector.extract_strided_slice %9 {offsets = [40, 0], sizes = [8, 32], strides = [1, 1]} : vector<64x32xf32> to vector<8x32xf32>
    %cst_11 = arith.constant dense<0.000000e+00> : vector<8x32xf32>
    %33 = tpu.matmul %31, %10, %cst_11 {dimension_numbers = #tpu.dot_dimension_numbers<[1], [1], [0], [0], [0, 0, 1, 0], [], []>} : vector<8x32xf32>, vector<32x32xf32>, vector<8x32xf32> -> vector<8x32xf32>
    %34 = arith.addf %32, %33 : vector<8x32xf32>
    %35 = math.tanh %34 : vector<8x32xf32>
    %36 = vector.extract_strided_slice %9 {offsets = [48, 0], sizes = [8, 32], strides = [1, 1]} : vector<64x32xf32> to vector<8x32xf32>
    %cst_12 = arith.constant dense<0.000000e+00> : vector<8x32xf32>
    %37 = tpu.matmul %35, %10, %cst_12 {dimension_numbers = #tpu.dot_dimension_numbers<[1], [1], [0], [0], [0, 0, 1, 0], [], []>} : vector<8x32xf32>, vector<32x32xf32>, vector<8x32xf32> -> vector<8x32xf32>
    %38 = arith.addf %36, %37 : vector<8x32xf32>
    %39 = math.tanh %38 : vector<8x32xf32>
    %40 = vector.extract_strided_slice %9 {offsets = [56, 0], sizes = [8, 32], strides = [1, 1]} : vector<64x32xf32> to vector<8x32xf32>
    %cst_13 = arith.constant dense<0.000000e+00> : vector<8x32xf32>
    %41 = tpu.matmul %39, %10, %cst_13 {dimension_numbers = #tpu.dot_dimension_numbers<[1], [1], [0], [0], [0, 0, 1, 0], [], []>} : vector<8x32xf32>, vector<32x32xf32>, vector<8x32xf32> -> vector<8x32xf32>
    %42 = arith.addf %40, %41 : vector<8x32xf32>
    %43 = math.tanh %42 : vector<8x32xf32>
    %44 = vector.shape_cast %15 : vector<8x32xf32> to vector<1x8x32xf32>
    %45 = vector.shape_cast %19 : vector<8x32xf32> to vector<1x8x32xf32>
    %46 = vector.shape_cast %23 : vector<8x32xf32> to vector<1x8x32xf32>
    %47 = vector.shape_cast %27 : vector<8x32xf32> to vector<1x8x32xf32>
    %48 = vector.shape_cast %31 : vector<8x32xf32> to vector<1x8x32xf32>
    %49 = vector.shape_cast %35 : vector<8x32xf32> to vector<1x8x32xf32>
    %50 = vector.shape_cast %39 : vector<8x32xf32> to vector<1x8x32xf32>
    %51 = vector.shape_cast %43 : vector<8x32xf32> to vector<1x8x32xf32>
    %52 = tpu.concatenate %44, %45, %46, %47, %48, %49, %50, %51 in 0 : vector<1x8x32xf32>, vector<1x8x32xf32>, vector<1x8x32xf32>, vector<1x8x32xf32>, vector<1x8x32xf32>, vector<1x8x32xf32>, vector<1x8x32xf32>, vector<1x8x32xf32> -> vector<8x8x32xf32>
    %53 = tpu.iota {dimensions = array<i32: 0>} : vector<8x8x1xi32>
    %c0_14 = arith.constant 0 : index
    %c0_15 = arith.constant 0 : index
    %54 = vector.load %arg1[%c0_14, %c0_15] : memref<8x1xi32, #tpu.memory_space<vmem>>, vector<8x1xi32>
    %55 = vector.shape_cast %54 : vector<8x1xi32> to vector<1x8x1xi32>
    %56 = vector.broadcast %55 : vector<1x8x1xi32> to vector<8x8x1xi32>
    %57 = arith.cmpi slt, %53, %56 : vector<8x8x1xi32>
    %cst_16 = arith.constant 0.000000e+00 : f32
    %58 = vector.shape_cast %57 : vector<8x8x1xi1> to vector<8x8x1xi1>
    %59 = vector.broadcast %58 : vector<8x8x1xi1> to vector<8x8x32xi1>
    %60 = vector.broadcast %cst_16 : f32 to vector<8x8x32xf32>
    %61 = arith.select %59, %52, %60 : vector<8x8x32xi1>, vector<8x8x32xf32>
    %c0_17 = arith.constant 0 : index
    %c0_18 = arith.constant 0 : index
    %c0_19 = arith.constant 0 : index
    %62 = vector.load %arg5[%c0_17, %c0_18, %c0_19] : memref<8x8x32xf32, #tpu.memory_space<vmem>>, vector<8x8x32xf32>
    tpu.vector_store %arg5[%c0_17, %c0_18, %c0_19], %61 {strides = array<i32>} : memref<8x8x32xf32, #tpu.memory_space<vmem>>, vector<8x8x32xf32>,
    return
  }
  func.func @transform_0(%arg0: i32) -> (i32, i32) {
    %c0_i32 = arith.constant 0 : i32
    %c0_i32_0 = arith.constant 0 : i32
    return %arg0, %c0_i32 : i32, i32
  }
  func.func @transform_1(%arg0: i32) -> (i32, i32) {
    %c0_i32 = arith.constant 0 : i32
    %c0_i32_0 = arith.constant 0 : i32
    return %c0_i32, %arg0 : i32, i32
  }
  func.func @transform_2(%arg0: i32) -> (i32, i32) {
    %c0_i32 = arith.constant 0 : i32
    %c0_i32_0 = arith.constant 0 : i32
    %c0_i32_1 = arith.constant 0 : i32
    return %c0_i32, %c0_i32_0 : i32, i32
  }
  func.func @transform_3(%arg0: i32) -> (i32, i32) {
    %c0_i32 = arith.constant 0 : i32
    %c0_i32_0 = arith.constant 0 : i32
    %c0_i32_1 = arith.constant 0 : i32
    return %c0_i32, %c0_i32_0 : i32, i32
  }
  func.func @transform_4(%arg0: i32) -> (i32, i32, i32) {
    %c0_i32 = arith.constant 0 : i32
    %c0_i32_0 = arith.constant 0 : i32
    %c0_i32_1 = arith.constant 0 : i32
    return %c0_i32, %arg0, %c0_i32_0 : i32, i32, i32
  }
}

</mosaic_0001>

<bundles_post_ra>
// kernel: rnn_encoder_impatient_forward.1
= control target key start
LH: loop header
LB: loop body
LE: loop exit
PB: predicated region body
PF: predicated region fallthrough
CT: control target
= control target key end

     0   :  { %v18_v0 = vlaneseq  ;;  %vm240_vm0 = vcmask 261120   ;;  %vm127_vm1 = vcmask 1041408   ;;  %v1225_v1 = vmov 0.0|0.0   ;;  %s1464_s1 = inlined_call_operand.vmem [shape: s32[8,8], index: 1, kind: input, shape index: {}]   ;;  %s1465_s3 = inlined_call_operand.vmem [shape: f32[32,32], index: 3, kind: input, shape index: {}]   ;;  %s1466_s2 = inlined_call_operand.vmem [shape: f32[10,32], index: 2, kind: input, shape index: {}]   ;;  %s1467_s0 = inlined_call_operand.vmem [shape: s32[8,1], index: 0, kind: input, shape index: {}]   ;;  %s1468_s4 = inlined_call_operand.vmem [shape: f32[8,8,32], index: 4, kind: output, shape index: {}]  }
   0x1   :  { %1138 = vmatprep.subr.bf16.mxu1 %v1225_v1  ;;  %v236_v2 = vld [vmem:[%s1465_s3] sm:$0xff]  ;;  %v237_v3 = vld [vmem:[%s1465_s3 + $0x8] sm:$0xff]  ;;  %vm1270_vm2 = vmpackc.low %vm240_vm0, %vm240_vm0  ;;  %vm1226_vm3 = vmmov 1   ;;  %vm1227_vm5 = vmmov 0   ;;  %v1228_v11 = vmov 0.0   ;;  %v1229_v15 = vmov 0  }
   0x2   :  { %v17_v4 = vld [vmem:[%s1464_s1] sm:$0xff]  ;;  %v21_v5 = vshrl.u32 %v18_v0, 7  ;;  %v1266_v6 = vpack.c.bf16 %v237_v3, %v236_v2  ;;  %v101_v9 = vld [vmem:[%s1466_s2 + $0x8] sm:$0x3]  ;;  %vm1280_vm4 = vmpackc.low %vm127_vm1, %vm1226_vm3  ;;  %1052 = vmatprep.mubr.msk.f32.mxu1 %vm1227_vm5, %v1228_v11  ;;  %1207 = vset.pattern.permute.xlu0 %v1229_v15  ;;  %v19_v35 = vand.u32 127, %v18_v0  ;;  %vm102_vm7 = vcmask 80896  }
   0x3   :  { %v100_v8 = vld [vmem:[%s1466_s2] sm:$0xff]  ;;  %v238_v16 = vld [vmem:[%s1465_s3 + $0x10] sm:$0xff]  ;;  %v239_v17 = vld [vmem:[%s1465_s3 + $0x18] sm:$0xff]  ;;  %1208 = vset.pattern.permute.xlu1 %v1229_v15 }
   0x4   :  { %v22_v12 = vsub.s32 0, %v21_v5  ;;  %v29_v13 = vsub.s32 1, %v21_v5  ;;  %1141 = vmatpush3.bf16.xpose.msk.msra.mxu1 %vm1270_vm2, %v1266_v6  ;;  %v1132_v14 = vpack.c.bf16 %v101_v9, %v100_v8  ;;  %v36_v18 = vsub.s32 2, %v21_v5  ;;  %v1312_v31 = vld [vmem:[%s1467_s0] sm:$0xff] }
   0x5   :  { %1142 = vmatprep.subr.bf16.mxu1 %v1225_v1  ;;  %v43_v19 = vsub.s32 3, %v21_v5  ;;  %v1302_v23 = vpack.c.bf16 %v239_v17, %v238_v16  ;;  %v50_v24 = vsub.s32 4, %v21_v5  ;;  %v57_v26 = vsub.s32 5, %v21_v5 }
   0x6   :  { %v23_v20 = vrot.slane %v17_v4, %v22_v12  ;;  %1134 = vmatprep.subr.msk.bf16.mxu0 %vm1280_vm4, %v1132_v14  ;;  %v37_v21 = vrot.slane %v17_v4, %v36_v18  ;;  %v30_v22 = vrot.slane %v17_v4, %v29_v13  ;;  %v64_v28 = vsub.s32 6, %v21_v5 }
   0x7   :  { %1137 = vmatpush3.bf16.msk.msra.mxu0 %vm1280_vm4, %v1132_v14  ;;  %v44_v25 = vrot.slane %v17_v4, %v43_v19  ;;  %v51_v27 = vrot.slane %v17_v4, %v50_v24  ;;  %v58_v29 = vrot.slane %v17_v4, %v57_v26  ;;  %v71_v30 = vsub.s32 7, %v21_v5 }
   0x8   :  { %25 = vbcast.lane.b32.xlu0 %v23_v20, 256  ;;  %1146 = vmatprep.subr.bf16.mxu0 %v1225_v1  ;;  %v65_v32 = vrot.slane %v17_v4, %v64_v28  ;;  %vm854_vm6 = vcmp.gt.s32.totalorder %v1312_v31, 0  ;;  %vm855_vm1 = vcmp.gt.s32.totalorder %v1312_v31, 1  ;;  %vm856_vm4 = vcmp.gt.s32.totalorder %v1312_v31, 2 }
   0x9   :  { %39 = vbcast.lane.b32.xlu1 %v37_v21, 256  ;;  %v72_v33 = vrot.slane %v17_v4, %v71_v30  ;;  %v862_v34 = vsel %vm854_vm6, 1, %v1229_v15  ;;  %v863_v52 = vsel %vm855_vm1, 1, %v1229_v15  ;;  %v864_v4 = vsel %vm856_vm4, 1, %v1229_v15 }
   0xc   :  { %32 = vbcast.lane.b32.xlu0 %v30_v22, 256  ;;  %1145 = vmatpush3.bf16.xpose.msk.msra.mxu1 %vm1270_vm2, %v1302_v23 }
   0xd   :  { %46 = vbcast.lane.b32.xlu1 %v44_v25, 256  ;;  %1154 = vmatprep.subr.bf16.mxu1 %v1225_v1 }
  0x10   :  { %53 = vbcast.lane.b32.xlu0 %v51_v27, 256 }
  0x11   :  { %60 = vbcast.lane.b32.xlu1 %v58_v29, 256 }
  0x13   :  { %1053 = vmatmul.mubr.f32.vlgmr.msra.gmra.mrb[0].mxu1 %v1228_v11 }
  0x14   :  { %67 = vbcast.lane.b32.xlu0 %v65_v32, 256  ;;  %1157 = vmatpush3.bf16.xpose.msk.msra.mxu1 %vm1270_vm2, %v1266_v6 }
  0x15   :  { %74 = vbcast.lane.b32.xlu1 %v72_v33, 256  ;;  %1158 = vmatprep.subr.bf16.mxu1 %v1225_v1 }
  0x16   :  { %1074 = vmatprep.mubr.msk.f32.mxu1 %vm1227_vm5, %v1228_v11 }
  0x18   :  { %871 = vperm.xlu0 %1207, %v862_v34  }
  0x19   :  { %874 = vperm.xlu1 %1208, %v863_v52  }
  0x1c   :  { %1161 = vmatpush3.bf16.xpose.msk.msra.mxu1 %vm1270_vm2, %v1302_v23 }
  0x1d   :  { %1170 = vmatprep.subr.bf16.mxu1 %v1225_v1  ;;  %877 = vperm.xlu1 %1208, %v864_v4  }
  0x7a   :  { %v26_v36 = vpop.permute.xlu0 %25 }
  0x7b   :  { %vm76_vm8 = vcmp.eq.s32.totalorder %v26_v36, %v19_v35  ;;  %v40_v37 = vpop.permute.xlu1 %39 }
  0x7c   :  { %v922_v38 = vsel %vm76_vm8, 1.0, %v1228_v11  ;;  %vm78_vm9 = vcmp.eq.s32.totalorder %v40_v37, %v19_v35 }
  0x7d   :  { %1032 = vmatprep.mubr.msk.f32.mxu0 %vm102_vm7, %v922_v38  ;;  %v924_v40 = vsel %vm78_vm9, 1.0, %v1228_v11  ;;  %vm858_vm9 = vcmp.gt.s32.totalorder %v1312_v31, 4 }
  0x7e   :  { %v33_v39 = vpop.permute.xlu0 %32  ;;  %v866_v22 = vsel %vm858_vm9, 1, %v1229_v15 }
  0x7f   :  { %vm77_vm10 = vcmp.eq.s32.totalorder %v33_v39, %v19_v35  ;;  %v47_v41 = vpop.permute.xlu1 %46  ;;  %883 = vperm.xlu1 %1208, %v866_v22  }
  0x80   :  { %v923_v42 = vsel %vm77_vm10, 1.0, %v1228_v11  ;;  %vm79_vm11 = vcmp.eq.s32.totalorder %v47_v41, %v19_v35 }
  0x81   :  { %1033 = vmatmul.mubr.msk.f32.vlgmr.msra.gmra.mrb[0].mxu0 %vm102_vm7, %v923_v42  ;;  %v925_v43 = vsel %vm79_vm11, 1.0, %v1228_v11  ;;  %vm859_vm11 = vcmp.gt.s32.totalorder %v1312_v31, 5 }
  0x82   :  { %1035 = vmatprep.mubr.msk.f32.mxu0 %vm102_vm7, %v924_v40  ;;  %1149 = vmatpush3.bf16.xpose.msk.msra.mxu0 %vm1270_vm2, %v1266_v6  ;;  %v54_v44 = vpop.permute.xlu0 %53  ;;  %v867_v30 = vsel %vm859_vm11, 1, %v1229_v15 }
  0x83   :  { %1150 = vmatprep.subr.bf16.mxu0 %v1225_v1  ;;  %vm80_vm12 = vcmp.eq.s32.totalorder %v54_v44, %v19_v35  ;;  %v61_v45 = vpop.permute.xlu1 %60 }
  0x84   :  { %v926_v46 = vsel %vm80_vm12, 1.0, %v1228_v11  ;;  %vm81_vm13 = vcmp.eq.s32.totalorder %v61_v45, %v19_v35 }
  0x85   :  { %1036 = vmatmul.mubr.msk.f32.gmra.mrb[2].mxu0 %vm102_vm7, %v925_v43  ;;  %v927_v47 = vsel %vm81_vm13, 1.0, %v1228_v11  ;;  %vm860_vm13 = vcmp.gt.s32.totalorder %v1312_v31, 6 }
  0x86   :  { %1038 = vmatprep.mubr.msk.f32.mxu0 %vm102_vm7, %v926_v46  ;;  %v68_v48 = vpop.permute.xlu0 %67  ;;  %v868_v38 = vsel %vm860_vm13, 1, %v1229_v15 }
  0x87   :  { %vm82_vm14 = vcmp.eq.s32.totalorder %v68_v48, %v19_v35  ;;  %v75_v49 = vpop.permute.xlu1 %74  ;;  %889 = vperm.xlu1 %1208, %v868_v38  }
  0x88   :  { %v928_v50 = vsel %vm82_vm14, 1.0, %v1228_v11  ;;  %vm83_vm15 = vcmp.eq.s32.totalorder %v75_v49, %v19_v35 }
  0x89   :  { %1039 = vmatmul.mubr.msk.f32.gmra.mrb[4].mxu0 %vm102_vm7, %v927_v47  ;;  %v929_v51 = vsel %vm83_vm15, 1.0, %v1228_v11 }
  0x8a   :  { %1153 = vmatpush3.bf16.xpose.msk.msra.mxu0 %vm1270_vm2, %v1302_v23  ;;  %1041 = vmatprep.mubr.msk.f32.mxu0 %vm102_vm7, %v928_v50 }
  0x8b   :  { %1162 = vmatprep.subr.bf16.mxu0 %v1225_v1 }
  0x8d   :  { %1042 = vmatmul.mubr.msk.f32.gmra.mrb[6].mxu0 %vm102_vm7, %v929_v51  ;;  %vm857_vm7 = vcmp.gt.s32.totalorder %v1312_v31, 3 }
  0x8e   :  { %1063 = vmatprep.mubr.msk.f32.mxu0 %vm1227_vm5, %v1228_v11  ;;  %v865_v14 = vsel %vm857_vm7, 1, %v1229_v15 }
  0x8f   :  { %880 = vperm.xlu0 %1207, %v865_v14  }
  0x93   :  { %886 = vperm.xlu0 %1207, %v867_v30  }
  0x97   :  { %v872_v60 = vpop.permute.xlu0 %871 }
  0x98   :  { %vm894_vm3 = vcmp.eq.s32.totalorder %v872_v60, 1  ;;  %v875_v10 = vpop.permute.xlu1 %874 }
  0x99   :  { %vm895_vm6 = vcmp.eq.s32.totalorder %v875_v10, 1 }
  0x9c   :  { %v878_v19 = vpop.permute.xlu1 %877 }
  0x9d   :  { %vm896_vm8 = vcmp.eq.s32.totalorder %v878_v19, 1 }
  0xe6   :  { %v322_v53 = vpop.f32.mrb[0].mxu1 }
  0xe7   :  { %v1054_v54 = vpop.f32.mrb[1].mxu1 }
  0xfe   :  { %v884_v35 = vpop.permute.xlu1 %883 }
  0xff   :  { %vm898_vm12 = vcmp.eq.s32.totalorder %v884_v35, 1 }
 0x106   :  { %v890_v44 = vpop.permute.xlu1 %889 }
 0x10e   :  { %v881_v27 = vpop.permute.xlu0 %880 }
 0x10f   :  { %vm897_vm10 = vcmp.eq.s32.totalorder %v881_v27, 1 }
 0x154   :  { %v1034_v55 = vpop.f32.mrb[0].mxu0 }
 0x155   :  { %v197_v56 = vpop.f32.mrb[1].mxu0 }
 0x156   :  { %v326_v57 = vadd.f32 %v322_v53, %v197_v56 }
 0x158   :  { %1209 = vtanh.f32 %v326_v57  ;;  %v1037_v58 = vpop.f32.mrb[2].mxu0 }
 0x159   :  { %v207_v59 = vpop.f32.mrb[3].mxu0 }
 0x15c   :  { %v1371_v63 = vpop.f32.mrb[4].mxu0 }
 0x15d   :  { %v217_v0 = vpop.f32.mrb[5].mxu0 }
 0x160   :  { %v1373_v2 = vpop.f32.mrb[6].mxu0 }
 0x161   :  { %v1375_v3 = vpop.f32.mrb[7].mxu0 }
 0x162   :  { %v1210_v61 = vpop.eup %1209 }
 0x163   :  { %v902_v62 = vsel %vm894_vm3, %v1210_v61, 0.0  ;;  %1064 = vmatmul.mubr.msk.f32.vlgmr.msra.gmra.mrb[8].mxu0 %vm240_vm0, %v1210_v61 }
 0x164   :  { %910 = vst.msk [vmem:[%s1468_s4] sm:$0xff] %vm240_vm0, %v902_v62  ;;  %1165 = vmatpush3.bf16.xpose.msk.msra.mxu0 %vm1270_vm2, %v1266_v6  ;;  %1085 = vmatprep.mubr.msk.f32.mxu0 %vm1227_vm5, %v1228_v11 }
 0x165   :  { %1166 = vmatprep.subr.bf16.mxu0 %v1225_v1 }
 0x16c   :  { %1169 = vmatpush3.bf16.xpose.msk.msra.mxu0 %vm1270_vm2, %v1302_v23 }
 0x16d   :  { %1178 = vmatprep.subr.bf16.mxu0 %v1225_v1 }
 0x236   :  { %v397_v5 = vpop.f32.mrb[8].mxu0 }
 0x237   :  { %v401_v8 = vadd.f32 %v1034_v55, %v397_v5  ;;  %v1065_v9 = vpop.f32.mrb[9].mxu0 }
 0x239   :  { %1211 = vtanh.f32 %v401_v8 }
 0x243   :  { %v1212_v12 = vpop.eup %1211 }
 0x244   :  { %v903_v13 = vsel %vm895_vm6, %v1212_v12, 0.0  ;;  %1075 = vmatmul.mubr.msk.f32.vlgmr.msra.gmra.mrb[2].mxu1 %vm240_vm0, %v1212_v12 }
 0x245   :  { %911 = vst.msk [vmem:[%s1468_s4 + $0x8] sm:$0xff] %vm240_vm0, %v903_v13  ;;  %1173 = vmatpush3.bf16.xpose.msk.msra.mxu1 %vm1270_vm2, %v1266_v6  ;;  %1096 = vmatprep.mubr.msk.f32.mxu1 %vm1227_vm5, %v1228_v11 }
 0x246   :  { %1174 = vmatprep.subr.bf16.mxu1 %v1225_v1 }
 0x24d   :  { %1177 = vmatpush3.bf16.xpose.msk.msra.mxu1 %vm1270_vm2, %v1302_v23 }
 0x24e   :  { %1186 = vmatprep.subr.bf16.mxu1 %v1225_v1 }
 0x317   :  { %v472_v16 = vpop.f32.mrb[2].mxu1 }
 0x318   :  { %v476_v17 = vadd.f32 %v472_v16, %v207_v59  ;;  %v1076_v18 = vpop.f32.mrb[3].mxu1 }
 0x31a   :  { %1213 = vtanh.f32 %v476_v17 }
 0x324   :  { %v1214_v20 = vpop.eup %1213 }
 0x325   :  { %v904_v21 = vsel %vm896_vm8, %v1214_v20, 0.0  ;;  %1086 = vmatmul.mubr.msk.f32.vlgmr.msra.gmra.mrb[10].mxu0 %vm240_vm0, %v1214_v20 }
 0x326   :  { %912 = vst.msk [vmem:[%s1468_s4 + $0x10] sm:$0xff] %vm240_vm0, %v904_v21  ;;  %1181 = vmatpush3.bf16.xpose.msk.msra.mxu0 %vm1270_vm2, %v1266_v6  ;;  %1107 = vmatprep.mubr.msk.f32.mxu0 %vm1227_vm5, %v1228_v11 }
 0x327   :  { %1182 = vmatprep.subr.bf16.mxu0 %v1225_v1 }
 0x32e   :  { %1185 = vmatpush3.bf16.xpose.msk.msra.mxu0 %vm1270_vm2, %v1302_v23 }
 0x32f   :  { %1194 = vmatprep.subr.bf16.mxu0 %v1225_v1 }
 0x3f8   :  { %v547_v24 = vpop.f32.mrb[10].mxu0 }
 0x3f9   :  { %v551_v25 = vadd.f32 %v1037_v58, %v547_v24  ;;  %v1087_v26 = vpop.f32.mrb[11].mxu0 }
 0x3fb   :  { %1215 = vtanh.f32 %v551_v25 }
 0x405   :  { %v1216_v28 = vpop.eup %1215 }
 0x406   :  { %v905_v29 = vsel %vm897_vm10, %v1216_v28, 0.0  ;;  %1097 = vmatmul.mubr.msk.f32.vlgmr.msra.gmra.mrb[4].mxu1 %vm240_vm0, %v1216_v28 }
 0x407   :  { %913 = vst.msk [vmem:[%s1468_s4 + $0x18] sm:$0xff] %vm240_vm0, %v905_v29  ;;  %1189 = vmatpush3.bf16.xpose.msk.msra.mxu1 %vm1270_vm2, %v1266_v6  ;;  %1118 = vmatprep.mubr.msk.f32.mxu1 %vm1227_vm5, %v1228_v11 }
 0x408   :  { %1190 = vmatprep.subr.bf16.mxu1 %v1225_v1 }
 0x40f   :  { %1193 = vmatpush3.bf16.xpose.msk.msra.mxu1 %vm1270_vm2, %v1302_v23 }
 0x4d9   :  { %v622_v32 = vpop.f32.mrb[4].mxu1 }
 0x4da   :  { %v626_v33 = vadd.f32 %v622_v32, %v217_v0  ;;  %v1098_v34 = vpop.f32.mrb[5].mxu1 }
 0x4dc   :  { %1217 = vtanh.f32 %v626_v33 }
 0x4e6   :  { %v1218_v36 = vpop.eup %1217 }
 0x4e7   :  { %v906_v37 = vsel %vm898_vm12, %v1218_v36, 0.0  ;;  %1108 = vmatmul.mubr.msk.f32.vlgmr.msra.gmra.mrb[12].mxu0 %vm240_vm0, %v1218_v36 }
 0x4e8   :  { %914 = vst.msk [vmem:[%s1468_s4 + $0x20] sm:$0xff] %vm240_vm0, %v906_v37  ;;  %1197 = vmatpush3.bf16.xpose.msk.msra.mxu0 %vm1270_vm2, %v1266_v6  ;;  %1129 = vmatprep.mubr.msk.f32.mxu0 %vm1227_vm5, %v1228_v11  ;;  %v887_v6 = vpop.permute.xlu0 %886  ;;  %vm900_vm5 = vcmp.eq.s32.totalorder %v890_v44, 1 }
 0x4e9   :  { %1198 = vmatprep.subr.bf16.mxu0 %v1225_v1  ;;  %vm899_vm14 = vcmp.eq.s32.totalorder %v887_v6, 1 }
 0x4f0   :  { %1201 = vmatpush3.bf16.xpose.msk.msra.mxu0 %vm1270_vm2, %v1302_v23  ;;  %vm861_vm2 = vcmp.gt.s32.totalorder %v1312_v31, 7 }
 0x4f1   :  { %v869_v1 = vsel %vm861_vm2, 1, %v1229_v15 }
 0x4f2   :  { %892 = vperm.xlu0 %1207, %v869_v1  }
 0x571   :  { %v893_v48 = vpop.permute.xlu0 %892 }
 0x572   :  { %vm901_vm15 = vcmp.eq.s32.totalorder %v893_v48, 1 }
 0x5ba   :  { %v697_v39 = vpop.f32.mrb[12].mxu0 }
 0x5bb   :  { %v701_v40 = vadd.f32 %v1371_v63, %v697_v39  ;;  %v1109_v41 = vpop.f32.mrb[13].mxu0 }
 0x5bd   :  { %1219 = vtanh.f32 %v701_v40 }
 0x5c7   :  { %v1220_v42 = vpop.eup %1219 }
 0x5c8   :  { %v907_v11 = vsel %vm899_vm14, %v1220_v42, 0.0  ;;  %1119 = vmatmul.mubr.msk.f32.vlgmr.msra.gmra.mrb[6].mxu1 %vm240_vm0, %v1220_v42 }
 0x5c9   :  { %915 = vst.msk [vmem:[%s1468_s4 + $0x28] sm:$0xff] %vm240_vm0, %v907_v11 }
 0x69b   :  { %v772_v7 = vpop.f32.mrb[6].mxu1 }
 0x69c   :  { %v776_v23 = vadd.f32 %v772_v7, %v1375_v3  ;;  %v1120_v43 = vpop.f32.mrb[7].mxu1 }
 0x69e   :  { %1221 = vtanh.f32 %v776_v23 }
 0x6a8   :  { %v1222_v45 = vpop.eup %1221 }
 0x6a9   :  { %v908_v46 = vsel %vm900_vm5, %v1222_v45, 0.0  ;;  %1130 = vmatmul.mubr.msk.f32.vlgmr.msra.gmra.mrb[14].mxu0 %vm240_vm0, %v1222_v45 }
 0x6aa   :  { %916 = vst.msk [vmem:[%s1468_s4 + $0x30] sm:$0xff] %vm240_vm0, %v908_v46 }
 0x77c   :  { %v847_v31 = vpop.f32.mrb[14].mxu0 }
 0x77d   :  { %v851_v15 = vadd.f32 %v1373_v2, %v847_v31  ;;  %v1131_v47 = vpop.f32.mrb[15].mxu0 }
 0x77f   :  { %1223 = vtanh.f32 %v851_v15 }
 0x789   :  { %v1224_v49 = vpop.eup %1223 }
 0x78a   :  { %v909_v50 = vsel %vm901_vm15, %v1224_v49, 0.0 }
 0x78b   :  { %917 = vst.msk [vmem:[%s1468_s4 + $0x38] sm:$0xff] %vm240_vm0, %v909_v50 }

</bundles_post_ra>
